<compile_context>
chip_gen: v7x
topology: tpu7x:2x2x1
jax: 0.10.0
libtpu: 0.0.40
codegen_flags: <defaults>
</compile_context>

<pallas_src>
import math

import jax
import jax.numpy as jnp
from jax import lax
from jax.experimental import pallas as pl
from jax.experimental.pallas import tpu as pltpu


def _iteration_last_row_kernel(x_ref, ww_ref, wo_ref, bo_ref,
                               win_ref, bin_ref, wout_ref, bout_ref, y_ref):
    # x_ref:   (Bb, N, C)  batch block of the input
    # ww_ref:  (5, C, C)   a/b/c/v1/v2 projections (each = torch W slice, T'd)
    # wo_ref:  (2, C, C)   o-projection split into the num1 / num2 halves
    # bo_ref:  (1, C)
    # win_ref: (C, M), bin_ref: (1, M), wout_ref: (M, C), bout_ref: (1, C)
    # y_ref:   (Bb, C)     == MLP(attn(x) + x)[:, -1, :] for this batch block
    Bb, N, C = x_ref.shape
    scale = 1.0 / math.sqrt(C)          # num_heads = 1 -> head_dim == C

    def dot_nn(a, b):                   # a @ b
        return jnp.dot(a, b, preferred_element_type=jnp.float32)

    def dot_nt(a, b):                   # a @ b.T without materializing b.T
        return lax.dot_general(a, b, (((1,), (1,)), ((), ())),
                               preferred_element_type=jnp.float32)

    # Shared-weight projections on the flattened (Bb*N, C) slab — one MXU call
    # per projection, each result lane-0 aligned.
    x2 = x_ref[...].reshape(Bb * N, C)
    amat = dot_nn(x2, ww_ref[0])        # only the last row per example is used
    bmat = dot_nn(x2, ww_ref[1])
    cmat = dot_nn(x2, ww_ref[2])
    v1m = dot_nn(x2, ww_ref[3])
    v2m = dot_nn(x2, ww_ref[4])

    # Per-example last-row triple attention (O(N^2), transposes folded into
    # dot_general contraction dims).  Bb is small & static -> unrolled.
    rows = []
    for bi in range(Bb):
        lo, hi = bi * N, (bi + 1) * N
        a_l = amat[hi - 1:hi, :]        # (1, C)  query = last position
        b_b = bmat[lo:hi, :]            # (N, C)
        c_b = cmat[lo:hi, :]            # (N, C)
        v1_b = v1m[lo:hi, :]            # (N, C)
        v2_b = v2m[lo:hi, :]            # (N, C)

        Xr = jnp.exp(dot_nt(a_l, b_b) * scale)   # (1, N): X[N-1, j]
        Zr = jnp.exp(dot_nt(a_l, c_b) * scale)   # (1, N): Z[k, N-1]
        Yb = jnp.exp(dot_nt(b_b, c_b) * scale)   # (N, N): Y[j, k]

        # S1[j] = X[i,j] * sum_k Y[j,k] Z[k,i];  S2[k] = (X@Y)[i,k] * Z[k,i]
        S1 = Xr * dot_nt(Zr, Yb)                 # (1, N)
        S2 = dot_nn(Xr, Yb) * Zr                 # (1, N)
        inv_down = 1.0 / jnp.sum(S1, axis=-1, keepdims=True)   # (1, 1)

        num1 = dot_nn(S1, v1_b)                  # (1, C)
        num2 = dot_nn(S2, v2_b)                  # (1, C)
        # o-proj: cat([num1,num2])/down @ Wo.T == (num1@Wo0 + num2@Wo1)/down
        attn = (dot_nn(num1, wo_ref[0]) + dot_nn(num2, wo_ref[1])) * inv_down \
               + bo_ref[...]
        rows.append(attn + x2[hi - 1:hi, :])     # residual on the last row

    y_last = jnp.concatenate(rows, axis=0)       # (Bb, C)

    # Single-row-per-example MLP, batched over the block.
    h = jnp.maximum(dot_nn(y_last, win_ref[...]) + bin_ref[...], 0.0)
    y_ref[...] = (dot_nn(h, wout_ref[...]) + bout_ref[...]).astype(y_ref.dtype)


def _pick_batch_block(B):
    """Whole batch in one fat step when small; otherwise a sublane-aligned
    (multiple-of-8) divisor so output blocks stay (8,128)-friendly."""
    if B <= 32:
        return B
    for cand in (32, 24, 16, 8):
        if B % cand == 0:
            return cand
    return B


def iteration_forward(x, ww_t, wo_t, b_o, win_t, b_in, wout_t, b_out):
    """Pallas implementation of Iteration.forward.

    x      : (B, N, C)
    ww_t   : (C, 5C) = attn.w.weight.T      (no bias)
    wo_t   : (2C, C) = attn.o.weight.T,  b_o   : (1, C)
    win_t  : (C, M)  = mlp.W_in.T,       b_in  : (1, M)
    wout_t : (M, C)  = mlp.W_out.T,      b_out : (1, C)
    returns (B, N+1, C) = cat([x, MLP(attn(x)+x)[:, -1:, :]], axis=1)
    """
    B, N, C = x.shape
    M = win_t.shape[1]
    itemsize = jnp.dtype(x.dtype).itemsize

    # Host-side one-time layout glue: lane-aligned per-projection weights.
    ww5 = jnp.transpose(ww_t.reshape(C, 5, C), (1, 0, 2))   # (5, C, C)
    wo2 = wo_t.reshape(2, C, C)                              # (2, C, C)

    Bb = _pick_batch_block(B)
    nsteps = B // Bb

    flops_per_ex = (5 * 2 * N * C * C        # a/b/c/v1/v2 projections
                    + 2 * (2 * N * C)        # X / Z row logits
                    + 2 * N * N * C          # full Y logits
                    + 2 * (2 * N * N)        # (Zr,Y) and (Xr,Y) reductions
                    + 2 * (2 * N * C)        # S1@v1, S2@v2
                    + 2 * (2 * C * C)        # o-projection halves
                    + 2 * (2 * C * M))       # single-row MLP in/out
    bytes_accessed = itemsize * (B * N * C + B * C
                                 + 5 * C * C + 2 * C * C + C
                                 + C * M + M + M * C + C)
    cost = pl.CostEstimate(flops=B * flops_per_ex,
                           transcendentals=B * (N * N + 2 * N),
                           bytes_accessed=bytes_accessed)

    const2 = lambda i: (0, 0)
    const3 = lambda i: (0, 0, 0)

    y_last = pl.pallas_call(
        _iteration_last_row_kernel,
        out_shape=jax.ShapeDtypeStruct((B, C), x.dtype),
        grid_spec=pltpu.PrefetchScalarGridSpec(
            num_scalar_prefetch=0,
            grid=(nsteps,),
            in_specs=[
                pl.BlockSpec((Bb, N, C), lambda i: (i, 0, 0)),
                pl.BlockSpec((5, C, C), const3),
                pl.BlockSpec((2, C, C), const3),
                pl.BlockSpec((1, C), const2),
                pl.BlockSpec((C, M), const2),
                pl.BlockSpec((1, M), const2),
                pl.BlockSpec((M, C), const2),
                pl.BlockSpec((1, C), const2),
            ],
            out_specs=pl.BlockSpec((Bb, C), lambda i: (i, 0)),
        ),
        compiler_params=pltpu.CompilerParams(
            # Shard over TCs only when there is real per-core work (v7x);
            # a single fat step stays on one TC.
            dimension_semantics=(("parallel",) if nsteps > 1
                                 else ("arbitrary",)),
        ),
        cost_estimate=cost,
    )(x, ww5, wo2, b_o, win_t, b_in, wout_t, b_out)

    # Layout glue: torch.cat([x, y[:, -1, :].unsqueeze(1)], dim=1)
    return jnp.concatenate([x, y_last[:, None, :]], axis=1)


def _iteration_reference(x, ww_t, wo_t, b_o, win_t, b_in, wout_t, b_out):
    """Pure-JAX brute-force transcription of the PyTorch math (O(N^3) form)."""
    B, N, C = x.shape
    scale = 1.0 / (C ** 0.5)

    def per_example(xb):
        w = xb @ ww_t
        a, b, c, v1, v2 = [w[:, i * C:(i + 1) * C] for i in range(5)]
        X = jnp.exp((a @ b.T) * scale)          # (i, j)
        Y = jnp.exp((b @ c.T) * scale)          # (j, k)
        Z = jnp.exp((c @ a.T) * scale)          # (k, i)
        W = X[:, :, None] * Y[None, :, :] * Z.T[:, None, :]     # (i, j, k)
        down = W.sum(axis=(1, 2))
        num1 = jnp.einsum('ijk,jd->id', W, v1)
        num2 = jnp.einsum('ijk,kd->id', W, v2)
        attn = (jnp.concatenate([num1, num2], axis=-1) / down[:, None]) @ wo_t
        attn = attn + b_o[0]
        y = attn + xb
        h = jax.nn.relu(y @ win_t + b_in[0])
        return h @ wout_t + b_out[0]

    y = jax.vmap(per_example)(x)
    return jnp.concatenate([x, y[:, -1:, :]], axis=1)


if __name__ == "__main__":
    # Module constants from the source: p = 20, d_model = 40, d_mlp = 32, H = 1
    p = 20
    d_model = p * 2          # 40
    d_mlp = 32
    batch = 2
    seq = 8

    key = jax.random.PRNGKey(0)
    kx, k1, k2, k3, k4, k5, k6, k7 = jax.random.split(key, 8)
    f32 = jnp.float32
    s = 1.0 / float(jnp.sqrt(jnp.float32(d_model)))

    x = jax.random.normal(kx, (batch, seq, d_model), dtype=f32)
    ww_t = jax.random.normal(k1, (d_model, 5 * d_model), dtype=f32) * (0.5 * s)
    wo_t = jax.random.normal(k2, (2 * d_model, d_model), dtype=f32) * s
    b_o = jax.random.normal(k3, (1, d_model), dtype=f32) * 0.1
    win_t = jax.random.normal(k4, (d_model, d_mlp), dtype=f32) * s
    b_in = jax.random.normal(k5, (1, d_mlp), dtype=f32) * 0.1
    wout_t = jax.random.normal(k6, (d_mlp, d_model), dtype=f32) * s
    b_out = jax.random.normal(k7, (1, d_model), dtype=f32) * 0.1

    out = iteration_forward(x, ww_t, wo_t, b_o, win_t, b_in, wout_t, b_out)
    out = jax.block_until_ready(out)

    ref = _iteration_reference(x, ww_t, wo_t, b_o, win_t, b_in, wout_t, b_out)
    assert out.shape == (batch, seq + 1, d_model)
    assert jnp.allclose(out, ref, rtol=1e-4, atol=1e-4), "mismatch vs reference"

    print("KERNEL_OK")
</pallas_src>

<mosaic_0001>
module attributes {stable_mosaic.version = 11 : i64} {
  func.func @_iteration_last_row_kernel(%arg0: i32, %arg1: memref<2x8x40xf32, #tpu.memory_space<vmem>>, %arg2: memref<5x40x40xf32, #tpu.memory_space<vmem>>, %arg3: memref<2x40x40xf32, #tpu.memory_space<vmem>>, %arg4: memref<1x40xf32, #tpu.memory_space<vmem>>, %arg5: memref<40x32xf32, #tpu.memory_space<vmem>>, %arg6: memref<1x32xf32, #tpu.memory_space<vmem>>, %arg7: memref<32x40xf32, #tpu.memory_space<vmem>>, %arg8: memref<1x40xf32, #tpu.memory_space<vmem>>, %arg9: memref<2x40xf32, #tpu.memory_space<vmem>>) attributes {dimension_semantics = [#tpu.dimension_semantics<arbitrary>], iteration_bounds = array<i64: 1>, scalar_prefetch = 0 : i64, scratch_operands = 0 : i64, tpu.core_type = #tpu.core_type<tc>, window_params = [{transform_indices = @transform_0, window_bounds = array<i64: 2, 8, 40>}, {pipeline_mode = #tpu.pipeline_mode<synchronous>, transform_indices = @transform_1, window_bounds = array<i64: 5, 40, 40>}, {pipeline_mode = #tpu.pipeline_mode<synchronous>, transform_indices = @transform_2, window_bounds = array<i64: 2, 40, 40>}, {pipeline_mode = #tpu.pipeline_mode<synchronous>, transform_indices = @transform_3, window_bounds = array<i64: 1, 40>}, {pipeline_mode = #tpu.pipeline_mode<synchronous>, transform_indices = @transform_4, window_bounds = array<i64: 40, 32>}, {pipeline_mode = #tpu.pipeline_mode<synchronous>, transform_indices = @transform_5, window_bounds = array<i64: 1, 32>}, {pipeline_mode = #tpu.pipeline_mode<synchronous>, transform_indices = @transform_6, window_bounds = array<i64: 32, 40>}, {pipeline_mode = #tpu.pipeline_mode<synchronous>, transform_indices = @transform_7, window_bounds = array<i64: 1, 40>}, {transform_indices = @transform_8, window_bounds = array<i64: 2, 40>}]} {
    %c0 = arith.constant 0 : index
    %c0_0 = arith.constant 0 : index
    %c0_1 = arith.constant 0 : index
    %0 = vector.load %arg1[%c0, %c0_0, %c0_1] : memref<2x8x40xf32, #tpu.memory_space<vmem>>, vector<2x8x40xf32>
    %1 = vector.shape_cast %0 : vector<2x8x40xf32> to vector<16x40xf32>
    %c0_2 = arith.constant 0 : index
    %c0_3 = arith.constant 0 : index
    %c0_4 = arith.constant 0 : index
    %2 = vector.load %arg2[%c0_2, %c0_3, %c0_4] : memref<5x40x40xf32, #tpu.memory_space<vmem>>, vector<1x40x40xf32>
    %3 = vector.shape_cast %2 : vector<1x40x40xf32> to vector<40x40xf32>
    %cst = arith.constant dense<0.000000e+00> : vector<16x40xf32>
    %4 = tpu.matmul %1, %3, %cst {dimension_numbers = #tpu.dot_dimension_numbers<[1], [0], [0], [1], [0, 0, 1, 1], [], []>} : vector<16x40xf32>, vector<40x40xf32>, vector<16x40xf32> -> vector<16x40xf32>
    %c1 = arith.constant 1 : index
    %c0_5 = arith.constant 0 : index
    %c0_6 = arith.constant 0 : index
    %5 = vector.load %arg2[%c1, %c0_5, %c0_6] : memref<5x40x40xf32, #tpu.memory_space<vmem>>, vector<1x40x40xf32>
    %6 = vector.shape_cast %5 : vector<1x40x40xf32> to vector<40x40xf32>
    %cst_7 = arith.constant dense<0.000000e+00> : vector<16x40xf32>
    %7 = tpu.matmul %1, %6, %cst_7 {dimension_numbers = #tpu.dot_dimension_numbers<[1], [0], [0], [1], [0, 0, 1, 1], [], []>} : vector<16x40xf32>, vector<40x40xf32>, vector<16x40xf32> -> vector<16x40xf32>
    %c2 = arith.constant 2 : index
    %c0_8 = arith.constant 0 : index
    %c0_9 = arith.constant 0 : index
    %8 = vector.load %arg2[%c2, %c0_8, %c0_9] : memref<5x40x40xf32, #tpu.memory_space<vmem>>, vector<1x40x40xf32>
    %9 = vector.shape_cast %8 : vector<1x40x40xf32> to vector<40x40xf32>
    %cst_10 = arith.constant dense<0.000000e+00> : vector<16x40xf32>
    %10 = tpu.matmul %1, %9, %cst_10 {dimension_numbers = #tpu.dot_dimension_numbers<[1], [0], [0], [1], [0, 0, 1, 1], [], []>} : vector<16x40xf32>, vector<40x40xf32>, vector<16x40xf32> -> vector<16x40xf32>
    %c3 = arith.constant 3 : index
    %c0_11 = arith.constant 0 : index
    %c0_12 = arith.constant 0 : index
    %11 = vector.load %arg2[%c3, %c0_11, %c0_12] : memref<5x40x40xf32, #tpu.memory_space<vmem>>, vector<1x40x40xf32>
    %12 = vector.shape_cast %11 : vector<1x40x40xf32> to vector<40x40xf32>
    %cst_13 = arith.constant dense<0.000000e+00> : vector<16x40xf32>
    %13 = tpu.matmul %1, %12, %cst_13 {dimension_numbers = #tpu.dot_dimension_numbers<[1], [0], [0], [1], [0, 0, 1, 1], [], []>} : vector<16x40xf32>, vector<40x40xf32>, vector<16x40xf32> -> vector<16x40xf32>
    %c4 = arith.constant 4 : index
    %c0_14 = arith.constant 0 : index
    %c0_15 = arith.constant 0 : index
    %14 = vector.load %arg2[%c4, %c0_14, %c0_15] : memref<5x40x40xf32, #tpu.memory_space<vmem>>, vector<1x40x40xf32>
    %15 = vector.shape_cast %14 : vector<1x40x40xf32> to vector<40x40xf32>
    %cst_16 = arith.constant dense<0.000000e+00> : vector<16x40xf32>
    %16 = tpu.matmul %1, %15, %cst_16 {dimension_numbers = #tpu.dot_dimension_numbers<[1], [0], [0], [1], [0, 0, 1, 1], [], []>} : vector<16x40xf32>, vector<40x40xf32>, vector<16x40xf32> -> vector<16x40xf32>
    %17 = vector.extract_strided_slice %4 {offsets = [7, 0], sizes = [1, 40], strides = [1, 1]} : vector<16x40xf32> to vector<1x40xf32>
    %18 = vector.extract_strided_slice %7 {offsets = [0, 0], sizes = [8, 40], strides = [1, 1]} : vector<16x40xf32> to vector<8x40xf32>
    %19 = vector.extract_strided_slice %10 {offsets = [0, 0], sizes = [8, 40], strides = [1, 1]} : vector<16x40xf32> to vector<8x40xf32>
    %20 = vector.extract_strided_slice %13 {offsets = [0, 0], sizes = [8, 40], strides = [1, 1]} : vector<16x40xf32> to vector<8x40xf32>
    %21 = vector.extract_strided_slice %16 {offsets = [0, 0], sizes = [8, 40], strides = [1, 1]} : vector<16x40xf32> to vector<8x40xf32>
    %cst_17 = arith.constant dense<0.000000e+00> : vector<1x8xf32>
    %22 = tpu.matmul %17, %18, %cst_17 {dimension_numbers = #tpu.dot_dimension_numbers<[1], [1], [0], [0], [0, 0, 1, 0], [], []>} : vector<1x40xf32>, vector<8x40xf32>, vector<1x8xf32> -> vector<1x8xf32>
    %cst_18 = arith.constant 0.158113882 : f32
    %23 = vector.broadcast %cst_18 : f32 to vector<1x8xf32>
    %24 = arith.mulf %22, %23 : vector<1x8xf32>
    %25 = math.exp %24 : vector<1x8xf32>
    %cst_19 = arith.constant dense<0.000000e+00> : vector<1x8xf32>
    %26 = tpu.matmul %17, %19, %cst_19 {dimension_numbers = #tpu.dot_dimension_numbers<[1], [1], [0], [0], [0, 0, 1, 0], [], []>} : vector<1x40xf32>, vector<8x40xf32>, vector<1x8xf32> -> vector<1x8xf32>
    %cst_20 = arith.constant 0.158113882 : f32
    %27 = vector.broadcast %cst_20 : f32 to vector<1x8xf32>
    %28 = arith.mulf %26, %27 : vector<1x8xf32>
    %29 = math.exp %28 : vector<1x8xf32>
    %cst_21 = arith.constant dense<0.000000e+00> : vector<8x8xf32>
    %30 = tpu.matmul %18, %19, %cst_21 {dimension_numbers = #tpu.dot_dimension_numbers<[1], [1], [0], [0], [0, 0, 1, 0], [], []>} : vector<8x40xf32>, vector<8x40xf32>, vector<8x8xf32> -> vector<8x8xf32>
    %cst_22 = arith.constant 0.158113882 : f32
    %31 = vector.broadcast %cst_22 : f32 to vector<8x8xf32>
    %32 = arith.mulf %30, %31 : vector<8x8xf32>
    %33 = math.exp %32 : vector<8x8xf32>
    %cst_23 = arith.constant dense<0.000000e+00> : vector<1x8xf32>
    %34 = tpu.matmul %29, %33, %cst_23 {dimension_numbers = #tpu.dot_dimension_numbers<[1], [1], [0], [0], [0, 0, 1, 0], [], []>} : vector<1x8xf32>, vector<8x8xf32>, vector<1x8xf32> -> vector<1x8xf32>
    %35 = arith.mulf %25, %34 : vector<1x8xf32>
    %cst_24 = arith.constant dense<0.000000e+00> : vector<1x8xf32>
    %36 = tpu.matmul %25, %33, %cst_24 {dimension_numbers = #tpu.dot_dimension_numbers<[1], [0], [0], [1], [0, 0, 1, 1], [], []>} : vector<1x8xf32>, vector<8x8xf32>, vector<1x8xf32> -> vector<1x8xf32>
    %37 = arith.mulf %36, %29 : vector<1x8xf32>
    %cst_25 = arith.constant dense<0.000000e+00> : vector<1xf32>
    %38 = vector.multi_reduction <add>, %35, %cst_25 [1] : vector<1x8xf32> to vector<1xf32>
    %39 = vector.shape_cast %38 : vector<1xf32> to vector<1x1xf32>
    %cst_26 = arith.constant 1.000000e+00 : f32
    %40 = vector.broadcast %cst_26 : f32 to vector<1x1xf32>
    %41 = arith.divf %40, %39 : vector<1x1xf32>
    %cst_27 = arith.constant dense<0.000000e+00> : vector<1x40xf32>
    %42 = tpu.matmul %35, %20, %cst_27 {dimension_numbers = #tpu.dot_dimension_numbers<[1], [0], [0], [1], [0, 0, 1, 1], [], []>} : vector<1x8xf32>, vector<8x40xf32>, vector<1x40xf32> -> vector<1x40xf32>
    %cst_28 = arith.constant dense<0.000000e+00> : vector<1x40xf32>
    %43 = tpu.matmul %37, %21, %cst_28 {dimension_numbers = #tpu.dot_dimension_numbers<[1], [0], [0], [1], [0, 0, 1, 1], [], []>} : vector<1x8xf32>, vector<8x40xf32>, vector<1x40xf32> -> vector<1x40xf32>
    %c0_29 = arith.constant 0 : index
    %c0_30 = arith.constant 0 : index
    %c0_31 = arith.constant 0 : index
    %44 = vector.load %arg3[%c0_29, %c0_30, %c0_31] : memref<2x40x40xf32, #tpu.memory_space<vmem>>, vector<1x40x40xf32>
    %45 = vector.shape_cast %44 : vector<1x40x40xf32> to vector<40x40xf32>
    %cst_32 = arith.constant dense<0.000000e+00> : vector<1x40xf32>
    %46 = tpu.matmul %42, %45, %cst_32 {dimension_numbers = #tpu.dot_dimension_numbers<[1], [0], [0], [1], [0, 0, 1, 1], [], []>} : vector<1x40xf32>, vector<40x40xf32>, vector<1x40xf32> -> vector<1x40xf32>
    %c1_33 = arith.constant 1 : index
    %c0_34 = arith.constant 0 : index
    %c0_35 = arith.constant 0 : index
    %47 = vector.load %arg3[%c1_33, %c0_34, %c0_35] : memref<2x40x40xf32, #tpu.memory_space<vmem>>, vector<1x40x40xf32>
    %48 = vector.shape_cast %47 : vector<1x40x40xf32> to vector<40x40xf32>
    %cst_36 = arith.constant dense<0.000000e+00> : vector<1x40xf32>
    %49 = tpu.matmul %43, %48, %cst_36 {dimension_numbers = #tpu.dot_dimension_numbers<[1], [0], [0], [1], [0, 0, 1, 1], [], []>} : vector<1x40xf32>, vector<40x40xf32>, vector<1x40xf32> -> vector<1x40xf32>
    %50 = arith.addf %46, %49 : vector<1x40xf32>
    %51 = vector.broadcast %41 : vector<1x1xf32> to vector<1x40xf32>
    %52 = arith.mulf %50, %51 : vector<1x40xf32>
    %c0_37 = arith.constant 0 : index
    %c0_38 = arith.constant 0 : index
    %53 = vector.load %arg4[%c0_37, %c0_38] : memref<1x40xf32, #tpu.memory_space<vmem>>, vector<1x40xf32>
    %54 = arith.addf %52, %53 : vector<1x40xf32>
    %55 = vector.extract_strided_slice %1 {offsets = [7, 0], sizes = [1, 40], strides = [1, 1]} : vector<16x40xf32> to vector<1x40xf32>
    %56 = arith.addf %54, %55 : vector<1x40xf32>
    %57 = vector.extract_strided_slice %4 {offsets = [15, 0], sizes = [1, 40], strides = [1, 1]} : vector<16x40xf32> to vector<1x40xf32>
    %58 = vector.extract_strided_slice %7 {offsets = [8, 0], sizes = [8, 40], strides = [1, 1]} : vector<16x40xf32> to vector<8x40xf32>
    %59 = vector.extract_strided_slice %10 {offsets = [8, 0], sizes = [8, 40], strides = [1, 1]} : vector<16x40xf32> to vector<8x40xf32>
    %60 = vector.extract_strided_slice %13 {offsets = [8, 0], sizes = [8, 40], strides = [1, 1]} : vector<16x40xf32> to vector<8x40xf32>
    %61 = vector.extract_strided_slice %16 {offsets = [8, 0], sizes = [8, 40], strides = [1, 1]} : vector<16x40xf32> to vector<8x40xf32>
    %cst_39 = arith.constant dense<0.000000e+00> : vector<1x8xf32>
    %62 = tpu.matmul %57, %58, %cst_39 {dimension_numbers = #tpu.dot_dimension_numbers<[1], [1], [0], [0], [0, 0, 1, 0], [], []>} : vector<1x40xf32>, vector<8x40xf32>, vector<1x8xf32> -> vector<1x8xf32>
    %cst_40 = arith.constant 0.158113882 : f32
    %63 = vector.broadcast %cst_40 : f32 to vector<1x8xf32>
    %64 = arith.mulf %62, %63 : vector<1x8xf32>
    %65 = math.exp %64 : vector<1x8xf32>
    %cst_41 = arith.constant dense<0.000000e+00> : vector<1x8xf32>
    %66 = tpu.matmul %57, %59, %cst_41 {dimension_numbers = #tpu.dot_dimension_numbers<[1], [1], [0], [0], [0, 0, 1, 0], [], []>} : vector<1x40xf32>, vector<8x40xf32>, vector<1x8xf32> -> vector<1x8xf32>
    %cst_42 = arith.constant 0.158113882 : f32
    %67 = vector.broadcast %cst_42 : f32 to vector<1x8xf32>
    %68 = arith.mulf %66, %67 : vector<1x8xf32>
    %69 = math.exp %68 : vector<1x8xf32>
    %cst_43 = arith.constant dense<0.000000e+00> : vector<8x8xf32>
    %70 = tpu.matmul %58, %59, %cst_43 {dimension_numbers = #tpu.dot_dimension_numbers<[1], [1], [0], [0], [0, 0, 1, 0], [], []>} : vector<8x40xf32>, vector<8x40xf32>, vector<8x8xf32> -> vector<8x8xf32>
    %cst_44 = arith.constant 0.158113882 : f32
    %71 = vector.broadcast %cst_44 : f32 to vector<8x8xf32>
    %72 = arith.mulf %70, %71 : vector<8x8xf32>
    %73 = math.exp %72 : vector<8x8xf32>
    %cst_45 = arith.constant dense<0.000000e+00> : vector<1x8xf32>
    %74 = tpu.matmul %69, %73, %cst_45 {dimension_numbers = #tpu.dot_dimension_numbers<[1], [1], [0], [0], [0, 0, 1, 0], [], []>} : vector<1x8xf32>, vector<8x8xf32>, vector<1x8xf32> -> vector<1x8xf32>
    %75 = arith.mulf %65, %74 : vector<1x8xf32>
    %cst_46 = arith.constant dense<0.000000e+00> : vector<1x8xf32>
    %76 = tpu.matmul %65, %73, %cst_46 {dimension_numbers = #tpu.dot_dimension_numbers<[1], [0], [0], [1], [0, 0, 1, 1], [], []>} : vector<1x8xf32>, vector<8x8xf32>, vector<1x8xf32> -> vector<1x8xf32>
    %77 = arith.mulf %76, %69 : vector<1x8xf32>
    %cst_47 = arith.constant dense<0.000000e+00> : vector<1xf32>
    %78 = vector.multi_reduction <add>, %75, %cst_47 [1] : vector<1x8xf32> to vector<1xf32>
    %79 = vector.shape_cast %78 : vector<1xf32> to vector<1x1xf32>
    %cst_48 = arith.constant 1.000000e+00 : f32
    %80 = vector.broadcast %cst_48 : f32 to vector<1x1xf32>
    %81 = arith.divf %80, %79 : vector<1x1xf32>
    %cst_49 = arith.constant dense<0.000000e+00> : vector<1x40xf32>
    %82 = tpu.matmul %75, %60, %cst_49 {dimension_numbers = #tpu.dot_dimension_numbers<[1], [0], [0], [1], [0, 0, 1, 1], [], []>} : vector<1x8xf32>, vector<8x40xf32>, vector<1x40xf32> -> vector<1x40xf32>
    %cst_50 = arith.constant dense<0.000000e+00> : vector<1x40xf32>
    %83 = tpu.matmul %77, %61, %cst_50 {dimension_numbers = #tpu.dot_dimension_numbers<[1], [0], [0], [1], [0, 0, 1, 1], [], []>} : vector<1x8xf32>, vector<8x40xf32>, vector<1x40xf32> -> vector<1x40xf32>
    %c0_51 = arith.constant 0 : index
    %c0_52 = arith.constant 0 : index
    %c0_53 = arith.constant 0 : index
    %84 = vector.load %arg3[%c0_51, %c0_52, %c0_53] : memref<2x40x40xf32, #tpu.memory_space<vmem>>, vector<1x40x40xf32>
    %85 = vector.shape_cast %84 : vector<1x40x40xf32> to vector<40x40xf32>
    %cst_54 = arith.constant dense<0.000000e+00> : vector<1x40xf32>
    %86 = tpu.matmul %82, %85, %cst_54 {dimension_numbers = #tpu.dot_dimension_numbers<[1], [0], [0], [1], [0, 0, 1, 1], [], []>} : vector<1x40xf32>, vector<40x40xf32>, vector<1x40xf32> -> vector<1x40xf32>
    %c1_55 = arith.constant 1 : index
    %c0_56 = arith.constant 0 : index
    %c0_57 = arith.constant 0 : index
    %87 = vector.load %arg3[%c1_55, %c0_56, %c0_57] : memref<2x40x40xf32, #tpu.memory_space<vmem>>, vector<1x40x40xf32>
    %88 = vector.shape_cast %87 : vector<1x40x40xf32> to vector<40x40xf32>
    %cst_58 = arith.constant dense<0.000000e+00> : vector<1x40xf32>
    %89 = tpu.matmul %83, %88, %cst_58 {dimension_numbers = #tpu.dot_dimension_numbers<[1], [0], [0], [1], [0, 0, 1, 1], [], []>} : vector<1x40xf32>, vector<40x40xf32>, vector<1x40xf32> -> vector<1x40xf32>
    %90 = arith.addf %86, %89 : vector<1x40xf32>
    %91 = vector.broadcast %81 : vector<1x1xf32> to vector<1x40xf32>
    %92 = arith.mulf %90, %91 : vector<1x40xf32>
    %c0_59 = arith.constant 0 : index
    %c0_60 = arith.constant 0 : index
    %93 = vector.load %arg4[%c0_59, %c0_60] : memref<1x40xf32, #tpu.memory_space<vmem>>, vector<1x40xf32>
    %94 = arith.addf %92, %93 : vector<1x40xf32>
    %95 = vector.extract_strided_slice %1 {offsets = [15, 0], sizes = [1, 40], strides = [1, 1]} : vector<16x40xf32> to vector<1x40xf32>
    %96 = arith.addf %94, %95 : vector<1x40xf32>
    %97 = tpu.concatenate %56, %96 in 0 : vector<1x40xf32>, vector<1x40xf32> -> vector<2x40xf32>
    %c0_61 = arith.constant 0 : index
    %c0_62 = arith.constant 0 : index
    %98 = vector.load %arg5[%c0_61, %c0_62] : memref<40x32xf32, #tpu.memory_space<vmem>>, vector<40x32xf32>
    %cst_63 = arith.constant dense<0.000000e+00> : vector<2x32xf32>
    %99 = tpu.matmul %97, %98, %cst_63 {dimension_numbers = #tpu.dot_dimension_numbers<[1], [0], [0], [1], [0, 0, 1, 1], [], []>} : vector<2x40xf32>, vector<40x32xf32>, vector<2x32xf32> -> vector<2x32xf32>
    %c0_64 = arith.constant 0 : index
    %c0_65 = arith.constant 0 : index
    %100 = vector.load %arg6[%c0_64, %c0_65] : memref<1x32xf32, #tpu.memory_space<vmem>>, vector<1x32xf32>
    %101 = vector.broadcast %100 : vector<1x32xf32> to vector<2x32xf32>
    %102 = arith.addf %99, %101 : vector<2x32xf32>
    %cst_66 = arith.constant 0.000000e+00 : f32
    %103 = vector.broadcast %cst_66 : f32 to vector<2x32xf32>
    %104 = arith.maximumf %102, %103 : vector<2x32xf32>
    %c0_67 = arith.constant 0 : index
    %c0_68 = arith.constant 0 : index
    %105 = vector.load %arg7[%c0_67, %c0_68] : memref<32x40xf32, #tpu.memory_space<vmem>>, vector<32x40xf32>
    %cst_69 = arith.constant dense<0.000000e+00> : vector<2x40xf32>
    %106 = tpu.matmul %104, %105, %cst_69 {dimension_numbers = #tpu.dot_dimension_numbers<[1], [0], [0], [1], [0, 0, 1, 1], [], []>} : vector<2x32xf32>, vector<32x40xf32>, vector<2x40xf32> -> vector<2x40xf32>
    %c0_70 = arith.constant 0 : index
    %c0_71 = arith.constant 0 : index
    %107 = vector.load %arg8[%c0_70, %c0_71] : memref<1x40xf32, #tpu.memory_space<vmem>>, vector<1x40xf32>
    %108 = vector.broadcast %107 : vector<1x40xf32> to vector<2x40xf32>
    %109 = arith.addf %106, %108 : vector<2x40xf32>
    %c0_72 = arith.constant 0 : index
    %c0_73 = arith.constant 0 : index
    %110 = vector.load %arg9[%c0_72, %c0_73] : memref<2x40xf32, #tpu.memory_space<vmem>>, vector<2x40xf32>
    tpu.vector_store %arg9[%c0_72, %c0_73], %109 {strides = array<i32>} : memref<2x40xf32, #tpu.memory_space<vmem>>, vector<2x40xf32>,
    return
  }
  func.func @transform_0(%arg0: i32) -> (i32, i32, i32) {
    %c0_i32 = arith.constant 0 : i32
    %c0_i32_0 = arith.constant 0 : i32
    %c0_i32_1 = arith.constant 0 : i32
    return %arg0, %c0_i32, %c0_i32_0 : i32, i32, i32
  }
  func.func @transform_1(%arg0: i32) -> (i32, i32, i32) {
    %c0_i32 = arith.constant 0 : i32
    %c0_i32_0 = arith.constant 0 : i32
    %c0_i32_1 = arith.constant 0 : i32
    %c0_i32_2 = arith.constant 0 : i32
    return %c0_i32, %c0_i32_0, %c0_i32_1 : i32, i32, i32
  }
  func.func @transform_2(%arg0: i32) -> (i32, i32, i32) {
    %c0_i32 = arith.constant 0 : i32
    %c0_i32_0 = arith.constant 0 : i32
    %c0_i32_1 = arith.constant 0 : i32
    %c0_i32_2 = arith.constant 0 : i32
    return %c0_i32, %c0_i32_0, %c0_i32_1 : i32, i32, i32
  }
  func.func @transform_3(%arg0: i32) -> (i32, i32) {
    %c0_i32 = arith.constant 0 : i32
    %c0_i32_0 = arith.constant 0 : i32
    %c0_i32_1 = arith.constant 0 : i32
    return %c0_i32, %c0_i32_0 : i32, i32
  }
  func.func @transform_4(%arg0: i32) -> (i32, i32) {
    %c0_i32 = arith.constant 0 : i32
    %c0_i32_0 = arith.constant 0 : i32
    %c0_i32_1 = arith.constant 0 : i32
    return %c0_i32, %c0_i32_0 : i32, i32
  }
  func.func @transform_5(%arg0: i32) -> (i32, i32) {
    %c0_i32 = arith.constant 0 : i32
    %c0_i32_0 = arith.constant 0 : i32
    %c0_i32_1 = arith.constant 0 : i32
    return %c0_i32, %c0_i32_0 : i32, i32
  }
  func.func @transform_6(%arg0: i32) -> (i32, i32) {
    %c0_i32 = arith.constant 0 : i32
    %c0_i32_0 = arith.constant 0 : i32
    %c0_i32_1 = arith.constant 0 : i32
    return %c0_i32, %c0_i32_0 : i32, i32
  }
  func.func @transform_7(%arg0: i32) -> (i32, i32) {
    %c0_i32 = arith.constant 0 : i32
    %c0_i32_0 = arith.constant 0 : i32
    %c0_i32_1 = arith.constant 0 : i32
    return %c0_i32, %c0_i32_0 : i32, i32
  }
  func.func @transform_8(%arg0: i32) -> (i32, i32) {
    %c0_i32 = arith.constant 0 : i32
    %c0_i32_0 = arith.constant 0 : i32
    return %arg0, %c0_i32 : i32, i32
  }
}

</mosaic_0001>

<bundles_post_ra>
// kernel: tpu_custom_call.1
= control target key start
LH: loop header
LB: loop body
LE: loop exit
PB: predicated region body
PF: predicated region fallthrough
CT: control target
= control target key end

     0   :  { %13 = vsyncpa [#allocation3], 0  ;;  %s2868_s0 = inlined_call_operand.vmem [shape: f32[2,8,40], index: 0, kind: input, shape index: {}]   ;;  %s2869_s1 = inlined_call_operand.hbm [shape: f32[5,40,40], index: 1, kind: input, shape index: {}]   ;;  %s2870_s2 = inlined_call_operand.hbm [shape: f32[2,40,40], index: 2, kind: input, shape index: {}]   ;;  %s2871_s3 = inlined_call_operand.vmem [shape: f32[1,40], index: 3, kind: input, shape index: {}]   ;;  %s2872_s4 = inlined_call_operand.vmem [shape: f32[40,32], index: 4, kind: input, shape index: {}]   ;;  %s2873_s5 = inlined_call_operand.vmem [shape: f32[1,32], index: 5, kind: input, shape index: {}]   ;;  %s2874_s6 = inlined_call_operand.vmem [shape: f32[32,40], index: 6, kind: input, shape index: {}]   ;;  %s2875_s7 = inlined_call_operand.vmem [shape: f32[1,40], index: 7, kind: input, shape index: {}]   ;;  %s2876_s8 = inlined_call_operand.hbm [shape: f32[2,40], index: 8, kind: output, shape index: {}]  }
   0x1   :  { %14 = vsyncpa [#allocation6], 0 }
   0x2   :  { %15 = vsyncpa [#allocation4], 0  ;;  %s2568_s27 = smov [#allocation2]   ;;  %s2496_s9 = scalar_lea.hbm %s2869_s1, 3200 }
   0x3   :  { %s23_s28 = sshll.u32 %s2568_s27, 4  ;;  %p2497_p0 = scmp.ne.s32.totalorder %s2869_s1, %s2496_s9  ;;  %s24_s28 = int_to_ptr.vmem [resolvable:$true] %s23_s28 }
   0x4   :  { %p2500_p1 = scmp.lt.u32.totalorder %s2496_s9, %s2869_s1 }
   0x6   :  { %p2502_p2 = pnand %p2500_p1, %p2497_p0 }
   0x8   :  { %2505 = shalt.err (!%p2502_p2)
}
   0x9   :  { %s2506_s14 = scalar_lea.vmem %s24_s28, 3200  ;;  %p2511_p4 = scmp.lt.s32.totalorder %s24_s28, %s24_s28 }
   0xa   :  { %p2507_p3 = scmp.ne.s32.totalorder %s24_s28, %s2506_s14  ;;  %p2512_p5 = scmp.lt.s32.totalorder %s2506_s14, %s2506_s14 }
   0xc   :  { %p2513_p6 = por %p2512_p5, %p2511_p4 }
   0xe   :  { %p2514_p7 = pnand %p2513_p6, %p2507_p3 }
  0x10   :  { %2517 = shalt.err (!%p2514_p7)
}
  0x11   :  { %s2569_s15 = smov 128   ;;  %s2570_s16 = smov 8  }
  0x12   :  { %29 = dma.hbm_to_vmem [thread:$0]  %s2869_s1, 3200, %s24_s28, [#allocation3], %s2569_s15, %s2569_s15, %s2570_s16  }
  0x13   :  { %s2571_s19 = smov [#allocation5]   ;;  %s2518_s23 = scalar_lea.hbm %s2870_s2, 1280 }
  0x14   :  { %s35_s20 = sshll.u32 %s2571_s19, 4  ;;  %p2519_p8 = scmp.ne.s32.totalorder %s2870_s2, %s2518_s23  ;;  %s36_s20 = int_to_ptr.vmem [resolvable:$true] %s35_s20 }
  0x15   :  { %p2522_p9 = scmp.lt.u32.totalorder %s2518_s23, %s2870_s2 }
  0x17   :  { %p2524_p10 = pnand %p2522_p9, %p2519_p8 }
  0x19   :  { %2527 = shalt.err (!%p2524_p10)
}
  0x1a   :  { %s2528_s29 = scalar_lea.vmem %s36_s20, 1280  ;;  %p2533_p12 = scmp.lt.s32.totalorder %s36_s20, %s36_s20 }
  0x1b   :  { %p2529_p11 = scmp.ne.s32.totalorder %s36_s20, %s2528_s29  ;;  %p2534_p13 = scmp.lt.s32.totalorder %s2528_s29, %s2528_s29 }
  0x1d   :  { %p2535_p0 = por %p2534_p13, %p2533_p12 }
  0x1f   :  { %p2536_p1 = pnand %p2535_p0, %p2529_p11 }
  0x21   :  { %2539 = shalt.err (!%p2536_p1)
}
  0x22   :  { %41 = dma.hbm_to_vmem [thread:$0]  %s2870_s2, 1280, %s36_s20, [#allocation6], %s2569_s15, %s2569_s15, %s2570_s16  }
  0x23   :  { %2562 = dma.done.wait [#allocation3], 3200  }
  0x24   :  { %2563 = vsyncadd [#allocation3], 4294964096 }
  0x25   :  { %2564 = dma.done.wait [#allocation6], 1280  }
  0x26   :  { %2565 = vsyncadd [#allocation6], 4294966016  ;;  %v60_v0 = vld [vmem:[#allocation2] sm:$0xff]  ;;  %v61_v1 = vld [vmem:[#allocation2 + $0x8] sm:$0xff]  ;;  %vm65_vm0 = vcmask 326656   ;;  %v2572_v30 = vmov 0.0  }
  0x27   :  { %v148_v2 = vld [vmem:[#allocation2 + $0x28] sm:$0xff]  ;;  %v2392_v3 = vpack.c.bf16 %v61_v1, %v60_v0  ;;  %v149_v4 = vld [vmem:[#allocation2 + $0x30] sm:$0xff]  ;;  %v63_v6 = vld [vmem:[#allocation2 + $0x18] sm:$0xff]  ;;  %vm2573_vm1 = vmmov 0   ;;  %vm700_vm2 = vcmask 64512   ;;  %v2574_v0 = vmov 0.0|0.0  }
  0x28   :  { %v62_v5 = vld [vmem:[#allocation2 + $0x10] sm:$0xff]  ;;  %v2400_v7 = vpack.c.bf16 %v149_v4, %v148_v2  ;;  %v150_v9 = vld [vmem:[#allocation2 + $0x38] sm:$0xff]  ;;  %v151_v10 = vld [vmem:[#allocation2 + $0x40] sm:$0xff]  ;;  %vm852_vm3 = vcmask 57344   ;;  %vm1852_vm4 = vcmask 1040384   ;;  %vm1951_vm5 = vcmask 261120  }
  0x29   :  { %v2396_v8 = vpack.c.bf16 %v63_v6, %v62_v5  ;;  %2393 = vmatprep.subr.bf16.mxu0 %v2392_v3  ;;  %v2404_v11 = vpack.c.bf16 %v151_v10, %v150_v9  ;;  %v2648_v12 = vld [vmem:[%s2868_s0] sm:$0xff]  ;;  %v152_v14 = vld [vmem:[#allocation2 + $0x48] sm:$0xff]  ;;  %v229_v15 = vld [vmem:[#allocation2 + $0x50] sm:$0xff]  ;;  %s2575_s9 = smov [#allocation7]   ;;  %vm2025_vm6 = vcmask 320512  }
  0x2a   :  { %2401 = vmatprep.subr.bf16.mxu1 %v2400_v7  ;;  %2395 = vmatpush3.bf16.msra.mxu0 %v2392_v3  ;;  %v64_v13 = vld [vmem:[#allocation2 + $0x20] sm:$0xff]  ;;  %v230_v16 = vld [vmem:[#allocation2 + $0x58] sm:$0xff]  ;;  %v232_v18 = vld [vmem:[#allocation2 + $0x68] sm:$0xff]  ;;  %s2033_s2 = sshll.u32 %s2575_s9, 4  ;;  %s2034_s2 = int_to_ptr.vmem [resolvable:$true] %s2033_s2 }
  0x2b   :  { %2403 = vmatpush3.bf16.msra.mxu1 %v2400_v7  ;;  %2397 = vmatprep.subr.bf16.mxu0 %v2396_v8  ;;  %v231_v17 = vld [vmem:[#allocation2 + $0x60] sm:$0xff]  ;;  %v310_v19 = vld [vmem:[#allocation2 + $0x78] sm:$0xff]  ;;  %v2657_v21 = vld [vmem:[%s2868_s0 + $0x8] sm:$0xff]  ;;  %v2408_v22 = vpack.c.bf16 %v230_v16, %v229_v15  ;;  %p2545_p3 = scmp.lt.s32.totalorder %s2034_s2, %s2034_s2 }
  0x2c   :  { %2405 = vmatprep.subr.bf16.mxu1 %v2404_v11  ;;  %2191 = vmatprep.mubr.msk.f32.mxu0 %vm65_vm0, %v2648_v12  ;;  %v311_v20 = vld [vmem:[#allocation2 + $0x80] sm:$0xff]  ;;  %v312_v23 = vld [vmem:[#allocation2 + $0x88] sm:$0xff]  ;;  %v313_v24 = vld [vmem:[#allocation2 + $0x90] sm:$0xff]  ;;  %v2412_v25 = vpack.c.bf16 %v232_v18, %v231_v17 }
  0x2d   :  { %2204 = vmatprep.mubr.msk.f32.mxu1 %vm65_vm0, %v2648_v12  ;;  %v2416_v26 = vpack.c.bf16 %v311_v20, %v310_v19  ;;  %v2420_v27 = vpack.c.bf16 %v313_v24, %v312_v23  ;;  %v233_v28 = vld [vmem:[#allocation2 + $0x70] sm:$0xff]  ;;  %v314_v29 = vld [vmem:[#allocation2 + $0x98] sm:$0xff]  ;;  %v391_v40 = vld [vmem:[#allocation2 + $0xa0] sm:$0xff] }
  0x2e   :  { %2399 = vmatpush3.bf16.msra.mxu0 %v2396_v8  ;;  %v392_v41 = vld [vmem:[#allocation2 + $0xa8] sm:$0xff]  ;;  %v393_v43 = vld [vmem:[#allocation2 + $0xb0] sm:$0xff]  ;;  %v394_v44 = vld [vmem:[#allocation2 + $0xb8] sm:$0xff] }
  0x2f   :  { %2407 = vmatpush3.bf16.msra.mxu1 %v2404_v11  ;;  %2189 = vmatprep.subr.mxu0 %v64_v13  ;;  %v2424_v42 = vpack.c.bf16 %v392_v41, %v391_v40  ;;  %v2428_v45 = vpack.c.bf16 %v394_v44, %v393_v43  ;;  %v395_v46 = vld [vmem:[#allocation2 + $0xc0] sm:$0xff]  ;;  %v1010_v1 = vld [vmem:[#allocation5 + $0x28] sm:$0xff]  ;;  %v1011_v2 = vld [vmem:[#allocation5 + $0x30] sm:$0xff] }
  0x30   :  { %2202 = vmatprep.subr.mxu1 %v152_v14  ;;  %v2717_v7 = vpack.c.bf16 %v1011_v2, %v1010_v1  ;;  %v1012_v10 = vld [vmem:[#allocation5 + $0x38] sm:$0xff]  ;;  %v1013_v11 = vld [vmem:[#allocation5 + $0x40] sm:$0xff]  ;;  %v2745_v15 = vld [vmem:[#allocation5 + $0x48] sm:$0xff] }
  0x31   :  { %v1004_v16 = vld [vmem:[#allocation5] sm:$0xff]  ;;  %v1005_v17 = vld [vmem:[#allocation5 + $0x8] sm:$0xff]  ;;  %v1006_v19 = vld [vmem:[#allocation5 + $0x10] sm:$0xff] }
  0x32   :  { %2190 = vmatpush3.msra.mxu0 %v64_v13  ;;  %v2758_v18 = vpack.c.bf16 %v1005_v17, %v1004_v16  ;;  %v1007_v20 = vld [vmem:[#allocation5 + $0x18] sm:$0xff]  ;;  %v1941_v17 = vld [vmem:[%s2874_s6 + $0x8] sm:$0xff] }
  0x33   :  { %2203 = vmatpush3.msra.mxu1 %v152_v14  ;;  %2192 = vmatmul.mubr.msk.f32.vlgmr.msra.gmra.mrb[0].mxu0 %vm65_vm0, %v2657_v21  ;;  %v2731_v14 = vpack.c.bf16 %v1013_v11, %v1012_v10  ;;  %v1858_v1 = vld [vmem:[%s2872_s4 + $0x20] sm:$0xff]  ;;  %v1846_v10 = vrot.slane %v2657_v21, 7 }
  0x34   :  { %2205 = vmatmul.mubr.msk.f32.vlgmr.msra.gmra.mrb[0].mxu1 %vm65_vm0, %v2657_v21  ;;  %2409 = vmatprep.subr.bf16.mxu0 %v2408_v22  ;;  %v1940_v16 = vld [vmem:[%s2874_s6] sm:$0xff] }
  0x35   :  { %2411 = vmatpush3.bf16.msra.mxu0 %v2408_v22  ;;  %2217 = vmatprep.mubr.msk.f32.mxu0 %vm65_vm0, %v2648_v12 }
  0x36   :  { %2413 = vmatprep.subr.bf16.mxu0 %v2412_v25  ;;  %2417 = vmatprep.subr.bf16.mxu1 %v2416_v26 }
  0x37   :  { %2419 = vmatpush3.bf16.msra.mxu1 %v2416_v26  ;;  %2230 = vmatprep.mubr.msk.f32.mxu1 %vm65_vm0, %v2648_v12 }
  0x38   :  { %2421 = vmatprep.subr.bf16.mxu1 %v2420_v27 }
  0x39   :  { %2415 = vmatpush3.bf16.msra.mxu0 %v2412_v25  ;;  %v2762_v25 = vpack.c.bf16 %v1007_v20, %v1006_v19 }
  0x3a   :  { %2215 = vmatprep.subr.mxu0 %v233_v28 }
  0x3b   :  { %2423 = vmatpush3.bf16.msra.mxu1 %v2420_v27 }
  0x3c   :  { %2228 = vmatprep.subr.mxu1 %v314_v29 }
  0x3d   :  { %2216 = vmatpush3.msra.mxu0 %v233_v28 }
  0x3e   :  { %2218 = vmatmul.mubr.msk.f32.vlgmr.msra.gmra.mrb[2].mxu0 %vm65_vm0, %v2657_v21  ;;  %2425 = vmatprep.subr.bf16.mxu0 %v2424_v42 }
  0x3f   :  { %2229 = vmatpush3.msra.mxu1 %v314_v29  ;;  %2243 = vmatprep.mubr.msk.f32.mxu0 %vm65_vm0, %v2648_v12  ;;  %v2769_v29 = vld [vmem:[#allocation5 + $0x20] sm:$0xff] }
  0x40   :  { %2231 = vmatmul.mubr.msk.f32.vlgmr.msra.gmra.mrb[2].mxu1 %vm65_vm0, %v2657_v21  ;;  %2246 = vmatprep.subr.mxu1 %v2572_v30 }
  0x41   :  { %2248 = vmatprep.mubr.msk.f32.mxu1 %vm2573_vm1, %v2572_v30  ;;  %2427 = vmatpush3.bf16.msra.mxu0 %v2424_v42 }
  0x42   :  { %2429 = vmatprep.subr.bf16.mxu0 %v2428_v45 }
  0x45   :  { %2431 = vmatpush3.bf16.msra.mxu0 %v2428_v45 }
  0x46   :  { %2241 = vmatprep.subr.mxu0 %v395_v46 }
  0x49   :  { %2242 = vmatpush3.msra.mxu0 %v395_v46 }
  0x4a   :  { %2244 = vmatmul.mubr.msk.f32.vlgmr.msra.gmra.mrb[4].mxu0 %vm65_vm0, %v2657_v21  ;;  %2261 = vmatprep.subr.mxu0 %v2572_v30  ;;  %v1943_v21 = vld [vmem:[%s2874_s6 + $0x18] sm:$0xff] }
  0x4b   :  { %2263 = vmatprep.mubr.msk.f32.mxu0 %vm2573_vm1, %v2572_v30 }
 0x106   :  { %v2676_v31 = vpop.f32.mrb[0].mxu0 }
 0x107   :  { %v2678_v32 = vpop.f32.mrb[0].mxu1  ;;  %v138_v33 = vpop.f32.mrb[1].mxu0  ;;  %v1168_v13 = vrot.slane %v2676_v31, 7 }
 0x108   :  { %v472_v34 = vrot.slane %v138_v33, 7  ;;  %v219_v35 = vpop.f32.mrb[1].mxu1 }
 0x109   :  { %2247 = vmatpush3.xpose.msk.msra.mxu1 %vm65_vm0, %v219_v35 }
 0x10a   :  { %2251 = vmatprep.subr.mxu1 %v2572_v30 }
 0x10c   :  { %2249 = vmatmul.mubr.msk.f32.vlgmr.msra.gmra.mrb[4].mxu1 %vm65_vm0, %v472_v34 }
 0x10d   :  { %2253 = vmatprep.mubr.msk.f32.mxu1 %vm2573_vm1, %v2572_v30 }
 0x111   :  { %v2685_v36 = vpop.f32.mrb[2].mxu0 }
 0x112   :  { %v300_v37 = vpop.f32.mrb[3].mxu0 }
 0x113   :  { %2252 = vmatpush3.xpose.msk.msra.mxu1 %vm65_vm0, %v300_v37  ;;  %v2688_v38 = vpop.f32.mrb[2].mxu1 }
 0x114   :  { %2256 = vmatprep.subr.mxu1 %v2572_v30  ;;  %v381_v39 = vpop.f32.mrb[3].mxu1 }
 0x116   :  { %2254 = vmatmul.mubr.msk.f32.vlgmr.msra.gmra.mrb[6].mxu1 %vm65_vm0, %v472_v34 }
 0x117   :  { %2257 = vmatpush3.xpose.msk.msra.mxu1 %vm65_vm0, %v300_v37  ;;  %2258 = vmatprep.mubr.msk.f32.mxu1 %vm2573_vm1, %v2572_v30 }
 0x118   :  { %2266 = vmatprep.subr.mxu1 %v2572_v30 }
 0x11a   :  { %2259 = vmatmul.mubr.msk.f32.vlgmr.msra.gmra.mrb[8].mxu1 %vm65_vm0, %v219_v35 }
 0x11b   :  { %2268 = vmatprep.mubr.msk.f32.mxu1 %vm2573_vm1, %v2572_v30 }
 0x11d   :  { %v2713_v62 = vpop.f32.mrb[4].mxu0 }
 0x11e   :  { %v462_v63 = vpop.f32.mrb[5].mxu0 }
 0x1df   :  { %v544_v47 = vpop.f32.mrb[4].mxu1 }
 0x1e0   :  { %v2250_v48 = vpop.f32.mrb[5].mxu1  ;;  %v548_v51 = vmul.f32 0.15811388, %v544_v47 }
 0x1e2   :  { %v549_v56 = vmul.f32 1.442695, %v548_v51 }
 0x1e9   :  { %v620_v49 = vpop.f32.mrb[6].mxu1 }
 0x1ea   :  { %v2255_v50 = vpop.f32.mrb[7].mxu1  ;;  %v624_v52 = vmul.f32 0.15811388, %v620_v49 }
 0x1ec   :  { %v625_v58 = vmul.f32 1.442695, %v624_v52 }
 0x1ed   :  { %v693_v53 = vpop.f32.mrb[8].mxu1 }
 0x1ee   :  { %v697_v54 = vmul.f32 0.15811388, %v693_v53  ;;  %v2260_v55 = vpop.f32.mrb[9].mxu1 }
 0x1f0   :  { %v698_v57 = vmul.f32 1.442695, %v697_v54 }
 0x1f2   :  { %2480 = vpow2.f32 %v698_v57 }
 0x1f3   :  { %2482 = vpow2.f32 %v549_v56 }
 0x1f4   :  { %2484 = vpow2.f32 %v625_v58  ;;  %v1854_v58 = vld [vmem:[%s2872_s4] sm:$0xff] }
 0x1fc   :  { %v2481_v59 = vpop.eup %2480 }
 0x1fd   :  { %v2483_v60 = vpop.eup %2482  ;;  %2262 = vmatpush3.xpose.msk.msra.mxu0 %vm700_vm2, %v2481_v59  ;;  %2267 = vmatpush3.msra.mxu1 %v2481_v59  ;;  %v1855_v59 = vld [vmem:[%s2872_s4 + $0x8] sm:$0xff] }
 0x1fe   :  { %2269 = vmatmul.mubr.msk.f32.vlgmr.msra.gmra.mrb[10].mxu1 %vm700_vm2, %v2483_v60  ;;  %2271 = vmatprep.subr.mxu0 %v2572_v30  ;;  %v2485_v61 = vpop.eup %2484 }
 0x1ff   :  { %2276 = vmatprep.subr.mxu1 %v2572_v30  ;;  %2278 = vmatprep.mubr.msk.f32.mxu1 %vm2573_vm1, %v2572_v30 }
 0x200   :  { %2264 = vmatmul.mubr.msk.f32.vlgmr.msra.gmra.mrb[6].mxu0 %vm700_vm2, %v2485_v61  ;;  %2277 = vmatpush3.msra.mxu1 %v462_v63 }
 0x201   :  { %2272 = vmatpush3.msra.mxu0 %v381_v39  ;;  %2273 = vmatprep.mubr.msk.f32.mxu0 %vm2573_vm1, %v2572_v30 }
 0x202   :  { %2307 = vmatprep.subr.mxu1 %v2572_v30  ;;  %2432 = vmatprep.subr.bf16.mxu0 %v2574_v0 }
 0x2d1   :  { %v847_v3 = vpop.f32.mrb[10].mxu1 }
 0x2d2   :  { %v851_v4 = vmul.f32 %v2485_v61, %v847_v3  ;;  %v2270_v5 = vpop.f32.mrb[11].mxu1  ;;  %v1856_v61 = vld [vmem:[%s2872_s4 + $0x10] sm:$0xff] }
 0x2d3   :  { %v773_v6 = vpop.f32.mrb[6].mxu0 }
 0x2d4   :  { %v2719_v8 = vmul.f32 %v2483_v60, %v773_v6  ;;  %v2265_v9 = vpop.f32.mrb[7].mxu0  ;;  %2279 = vmatmul.mubr.msk.f32.vlgmr.msra.gmra.mrb[12].mxu1 %vm700_vm2, %v851_v4  ;;  %v2457_v60 = vpack.c.bf16 %v1855_v59, %v1854_v58 }
 0x2d5   :  { %2308 = vmatpush3.xpose.msk.msra.mxu1 %vm65_vm0, %v2678_v32  ;;  %2309 = vmatprep.mubr.msk.f32.mxu1 %vm2573_vm1, %v2572_v30 }
 0x2d6   :  { %2274 = vmatmul.mubr.msk.f32.vlgmr.msra.gmra.mrb[8].mxu0 %vm700_vm2, %v2719_v8  ;;  %2312 = vmatprep.subr.mxu1 %v2572_v30  ;;  %v853_v53 = vsel %vm852_vm3, %v2719_v8, 0.0 }
 0x2d7   :  { %2434 = vmatpush3.bf16.msra.mxu0 %v2717_v7  ;;  %2291 = vmatprep.mubr.msk.f32.mxu0 %vm2573_vm1, %v2572_v30 }
 0x2d8   :  { %2310 = vmatmul.mubr.msk.f32.vlgmr.msra.gmra.mrb[14].mxu1 %vm65_vm0, %v1168_v13  ;;  %2435 = vmatprep.subr.bf16.mxu0 %v2574_v0 }
 0x2d9   :  { %2313 = vmatpush3.xpose.msk.msra.mxu1 %vm65_vm0, %v2685_v36  ;;  %2314 = vmatprep.mubr.msk.f32.mxu1 %vm2573_vm1, %v2572_v30 }
 0x2da   :  { %2317 = vmatprep.subr.mxu1 %v2572_v30 }
 0x2db   :  { %2437 = vmatpush3.bf16.msra.mxu0 %v2731_v14 }
 0x2dc   :  { %2315 = vmatmul.mubr.msk.f32.vlgmr.msra.gmra.mrb[16].mxu1 %vm65_vm0, %v1168_v13  ;;  %2289 = vmatprep.subr.mxu0 %v2572_v30 }
 0x2dd   :  { %2318 = vmatpush3.xpose.msk.msra.mxu1 %vm65_vm0, %v2685_v36  ;;  %2319 = vmatprep.mubr.msk.f32.mxu1 %vm2573_vm1, %v2572_v30 }
 0x2de   :  { %2322 = vmatprep.subr.mxu1 %v2572_v30 }
 0x2df   :  { %2290 = vmatpush3.msra.mxu0 %v2745_v15 }
 0x2e0   :  { %2320 = vmatmul.mubr.msk.f32.vlgmr.msra.gmra.mrb[18].mxu1 %vm65_vm0, %v2678_v32  ;;  %2438 = vmatprep.subr.bf16.mxu0 %v2574_v0 }
 0x2e1   :  { %2324 = vmatprep.mubr.msk.f32.mxu1 %vm2573_vm1, %v2572_v30 }
 0x3a7   :  { %v1000_v22 = vpop.f32.mrb[12].mxu1 }
 0x3a8   :  { %v2280_v23 = vpop.f32.mrb[13].mxu1  ;;  %2292 = vmatmul.mubr.msk.f32.vlgmr.msra.gmra.mrb[10].mxu0 %vm65_vm0, %v1000_v22  ;;  %v2463_v22 = vpack.c.bf16 %v1941_v17, %v1940_v16 }
 0x3a9   :  { %2440 = vmatpush3.bf16.msra.mxu0 %v2758_v18  ;;  %v927_v24 = vpop.f32.mrb[8].mxu0  ;;  %2304 = vmatprep.mubr.msk.f32.mxu0 %vm2573_vm1, %v2572_v30 }
 0x3aa   :  { %v2275_v26 = vpop.f32.mrb[9].mxu0  ;;  %2441 = vmatprep.subr.bf16.mxu0 %v2574_v0 }
 0x3ab   :  { %v1240_v27 = vpop.f32.mrb[14].mxu1 }
 0x3ac   :  { %v2311_v28 = vpop.f32.mrb[15].mxu1  ;;  %v1244_v39 = vmul.f32 0.15811388, %v1240_v27 }
 0x3ad   :  { %2443 = vmatpush3.bf16.msra.mxu0 %v2762_v25 }
 0x3ae   :  { %2302 = vmatprep.subr.mxu0 %v2572_v30  ;;  %v1245_v41 = vmul.f32 1.442695, %v1244_v39 }
 0x3af   :  { %v1316_v31 = vpop.f32.mrb[16].mxu1 }
 0x3b0   :  { %v2316_v32 = vpop.f32.mrb[17].mxu1  ;;  %v1320_v33 = vmul.f32 0.15811388, %v1316_v31 }
 0x3b1   :  { %2303 = vmatpush3.msra.mxu0 %v2769_v29 }
 0x3b2   :  { %2305 = vmatmul.mubr.msk.f32.vlgmr.msra.gmra.mrb[10].mxu0 %vm65_vm0, %v927_v24  ;;  %2332 = vmatprep.subr.mxu0 %v2572_v30  ;;  %v1321_v40 = vmul.f32 1.442695, %v1320_v33 }
 0x3b3   :  { %2333 = vmatpush3.msra.mxu0 %v2688_v38  ;;  %v1389_v34 = vpop.f32.mrb[18].mxu1  ;;  %2334 = vmatprep.mubr.msk.f32.mxu0 %vm2573_vm1, %v2572_v30 }
 0x3b4   :  { %v1393_v35 = vmul.f32 0.15811388, %v1389_v34  ;;  %v2321_v36 = vpop.f32.mrb[19].mxu1  ;;  %2444 = vmatprep.subr.bf16.mxu0 %v2574_v0 }
 0x3b6   :  { %v1394_v37 = vmul.f32 1.442695, %v1393_v35 }
 0x3b8   :  { %2486 = vpow2.f32 %v1394_v37 }
 0x3b9   :  { %2488 = vpow2.f32 %v1321_v40 }
 0x3ba   :  { %2490 = vpow2.f32 %v1245_v41 }
 0x3c2   :  { %v2487_v42 = vpop.eup %2486 }
 0x3c3   :  { %2323 = vmatpush3.xpose.msk.msra.mxu1 %vm700_vm2, %v2487_v42  ;;  %v2489_v38 = vpop.eup %2488 }
 0x3c4   :  { %2327 = vmatprep.subr.mxu1 %v2572_v30  ;;  %v2491_v43 = vpop.eup %2490 }
 0x3c6   :  { %2325 = vmatmul.mubr.msk.f32.vlgmr.msra.gmra.mrb[20].mxu1 %vm700_vm2, %v2489_v38 }
 0x3c7   :  { %2328 = vmatpush3.msra.mxu1 %v2487_v42  ;;  %2329 = vmatprep.mubr.msk.f32.mxu1 %vm2573_vm1, %v2572_v30 }
 0x3c8   :  { %2337 = vmatprep.subr.mxu1 %v2572_v30 }
 0x3ca   :  { %2330 = vmatmul.mubr.msk.f32.vlgmr.msra.gmra.mrb[22].mxu1 %vm700_vm2, %v2491_v43 }
 0x3cb   :  { %2338 = vmatpush3.msra.mxu1 %v2713_v62  ;;  %2339 = vmatprep.mubr.msk.f32.mxu1 %vm2573_vm1, %v2572_v30  ;;  %v1857_v62 = vld [vmem:[%s2872_s4 + $0x18] sm:$0xff] }
 0x3cc   :  { %2456 = vmatprep.subr.bf16.mxu1 %v2574_v0  ;;  %v2460_v63 = vpack.c.bf16 %v1857_v62, %v1856_v61 }
 0x485   :  { %v1157_v44 = vpop.f32.mrb[10].mxu0 }
 0x486   :  { %v2306_v45 = vpop.f32.mrb[11].mxu0 }
 0x499   :  { %v1468_v46 = vpop.f32.mrb[20].mxu1 }
 0x49a   :  { %v1472_v47 = vmul.f32 %v2491_v43, %v1468_v46  ;;  %v2326_v48 = vpop.f32.mrb[21].mxu1 }
 0x49c   :  { %2335 = vmatmul.mubr.msk.f32.vlgmr.msra.gmra.mrb[12].mxu0 %vm700_vm2, %v1472_v47  ;;  %v1547_v49 = vsel %vm852_vm3, %v1472_v47, 0.0 }
 0x49d   :  { %1548 = vadd.xlane.f32.xlu0 %v1547_v49  ;;  %v1542_v50 = vpop.f32.mrb[22].mxu1  ;;  %2446 = vmatpush3.bf16.msra.mxu0 %v2717_v7  ;;  %v1162_v7 = vld [vmem:[%s2871_s3] sm:$0x1] }
 0x49e   :  { %v1546_v51 = vmul.f32 %v2489_v38, %v1542_v50  ;;  %v2331_v52 = vpop.f32.mrb[23].mxu1  ;;  %2447 = vmatprep.subr.bf16.mxu0 %v2574_v0  ;;  %2352 = vmatprep.mubr.msk.f32.mxu0 %vm2573_vm1, %v2572_v30 }
 0x4a0   :  { %2340 = vmatmul.mubr.msk.f32.vlgmr.msra.gmra.mrb[24].mxu1 %vm700_vm2, %v1546_v51 }
 0x4a1   :  { %854 = vadd.xlane.f32.xlu0 %v853_v53  ;;  %2449 = vmatpush3.bf16.msra.mxu0 %v2731_v14  ;;  %v1164_v14 = vrot.slane %v2648_v12, 7  ;;  %v1942_v12 = vld [vmem:[%s2874_s6 + $0x10] sm:$0xff]  ;;  %s2540_s6 = scalar_lea.vmem %s2034_s2, 32 }
 0x4a2   :  { %2350 = vmatprep.subr.mxu0 %v2572_v30  ;;  %2378 = vmatprep.mubr.msk.f32.mxu1 %vm2573_vm1, %v2572_v30  ;;  %v2466_v24 = vpack.c.bf16 %v1943_v21, %v1942_v12  ;;  %p2541_p2 = scmp.ne.s32.totalorder %s2034_s2, %s2540_s6  ;;  %p2546_p4 = scmp.lt.s32.totalorder %s2540_s6, %s2540_s6 }
 0x4a3   :  { %2458 = vmatpush3.bf16.msra.mxu1 %v2457_v60 }
 0x4a4   :  { %2459 = vmatprep.subr.bf16.mxu1 %v2574_v0  ;;  %p2547_p5 = por %p2546_p4, %p2545_p3 }
 0x4a5   :  { %2351 = vmatpush3.msra.mxu0 %v2745_v15 }
 0x4a6   :  { %2450 = vmatprep.subr.bf16.mxu0 %v2574_v0  ;;  %p2548_p6 = pnand %p2547_p5, %p2541_p2 }
 0x4a7   :  { %2461 = vmatpush3.bf16.msra.mxu1 %v2460_v63 }
 0x4a8   :  { %2376 = vmatprep.subr.mxu1 %v2572_v30 }
 0x4ab   :  { %2377 = vmatpush3.msra.mxu1 %v1858_v1 }
 0x4ac   :  { %2462 = vmatprep.subr.bf16.mxu1 %v2574_v0 }
 0x52a   :  { %v1549_v2 = vpop.xlane.xlu0 %1548 }
 0x52e   :  { %v855_v3 = vpop.xlane.xlu0 %854 }
 0x52f   :  { %2492 = vrcp.f32 %v855_v3 }
 0x530   :  { %2494 = vrcp.f32 %v1549_v2 }
 0x539   :  { %v2493_v4 = vpop.eup %2492 }
 0x53a   :  { %v1161_v5 = vmul.f32 %v2493_v4, %v1157_v44  ;;  %v2495_v6 = vpop.eup %2494 }
 0x53c   :  { %v1163_v13 = vadd.f32 %v1162_v7, %v1161_v5 }
 0x53e   :  { %v1166_v19 = vadd.f32 %v1164_v14, %v1163_v13 }
 0x56f   :  { %v1621_v54 = vpop.f32.mrb[12].mxu0 }
 0x570   :  { %v2336_v55 = vpop.f32.mrb[13].mxu0 }
 0x573   :  { %v1694_v56 = vpop.f32.mrb[24].mxu1 }
 0x574   :  { %v2341_v57 = vpop.f32.mrb[25].mxu1  ;;  %2353 = vmatmul.mubr.msk.f32.vlgmr.msra.gmra.mrb[14].mxu0 %vm65_vm0, %v1694_v56 }
 0x575   :  { %2452 = vmatpush3.bf16.msra.mxu0 %v2758_v18  ;;  %2365 = vmatprep.mubr.msk.f32.mxu0 %vm2573_vm1, %v2572_v30 }
 0x576   :  { %2453 = vmatprep.subr.bf16.mxu0 %v2574_v0 }
 0x579   :  { %2455 = vmatpush3.bf16.msra.mxu0 %v2762_v25  ;;  %v2079_v25 = vld [vmem:[%s2873_s5] ss:$0 sm:$0xff] }
 0x57a   :  { %2363 = vmatprep.subr.mxu0 %v2572_v30 }
 0x57d   :  { %2364 = vmatpush3.msra.mxu0 %v2769_v29 }
 0x57e   :  { %2366 = vmatmul.mubr.msk.f32.vlgmr.msra.gmra.mrb[14].mxu0 %vm65_vm0, %v1621_v54 }
 0x651   :  { %v1840_v8 = vpop.f32.mrb[14].mxu0 }
 0x652   :  { %v1844_v9 = vmul.f32 %v2495_v6, %v1840_v8  ;;  %v2367_v11 = vpop.f32.mrb[15].mxu0 }
 0x654   :  { %v1845_v15 = vadd.f32 %v1844_v9, %v1162_v7 }
 0x656   :  { %v1848_v18 = vadd.f32 %v1846_v10, %v1845_v15 }
 0x658   :  { %v1850_v20 = vrot.slane %v1848_v18, 7 }
 0x65a   :  { %v1853_v23 = vsel %vm1852_vm4, %v1166_v19, %v1850_v20 }
 0x65b   :  { %2379 = vmatmul.mubr.msk.f32.vlgmr.msra.gmra.mrb[26].mxu1 %vm65_vm0, %v1853_v23 }
 0x65c   :  { %2464 = vmatpush3.bf16.msra.mxu1 %v2463_v22  ;;  %2389 = vmatprep.mubr.msk.f32.mxu1 %vm2573_vm1, %v2572_v30 }
 0x65d   :  { %2465 = vmatprep.subr.bf16.mxu1 %v2574_v0  ;;  %v2081_v0 = vld [vmem:[%s2875_s7] ss:$0 sm:$0xff] }
 0x660   :  { %2467 = vmatpush3.bf16.msra.mxu1 %v2466_v24 }
 0x72e   :  { %v1935_v26 = vpop.f32.mrb[26].mxu1 }
 0x72f   :  { %v1936_v27 = vadd.f32 %v2079_v25, %v1935_v26  ;;  %v2380_v28 = vpop.f32.mrb[27].mxu1 }
 0x731   :  { %v1939_v30 = vmax.f32 %v1936_v27, 0.0 }
 0x733   :  { %2390 = vmatmul.mubr.msk.f32.vlgmr.msra.gmra.mrb[28].mxu1 %vm1951_vm5, %v1939_v30 }
 0x806   :  { %v2021_v29 = vpop.f32.mrb[28].mxu1 }
 0x807   :  { %v2022_v31 = vadd.f32 %v2081_v0, %v2021_v29  ;;  %v2391_v32 = vpop.f32.mrb[29].mxu1 }
 0x809   :  { %2026 = vst.msk [vmem:[#allocation7] sm:$0x3] %vm2025_vm6, %v2022_v31 }
 0x80a   :  { %2551 = shalt.err (!%p2548_p6)
}
 0x80b   :  { %s2552_s0 = scalar_lea.hbm %s2876_s8, 32 }
 0x80c   :  { %p2553_p7 = scmp.ne.s32.totalorder %s2876_s8, %s2552_s0  ;;  %p2556_p8 = scmp.lt.u32.totalorder %s2552_s0, %s2876_s8 }
 0x80e   :  { %p2558_p9 = pnand %p2556_p8, %p2553_p7 }
 0x810   :  { %2561 = shalt.err (!%p2558_p9)
}
 0x811   :  { %2036 = dma.vmem_to_hbm [thread:$0]  %s2034_s2, 32, %s2876_s8, [#allocation4]  }
 0x812   :  { %2566 = dma.done.wait [#allocation4], 32  }
 0x813   :  { %2567 = vsyncadd [#allocation4], 4294967264 }
 0x814   :  { %2040 = vsyncpa [#allocation3], 1 }
 0x815   :  { %2041 = vsyncpa [#allocation6], 1 }
 0x816   :  { %2042 = vsyncpa [#allocation4], 1 }

</bundles_post_ra>
